<compile_context>
chip_gen: v7x
topology: tpu7x:2x2x1
jax: 0.10.0
libtpu: 0.0.40
codegen_flags: <defaults>
</compile_context>

<pallas_src>
import functools

import numpy as np
import jax
import jax.numpy as jnp
from jax import lax
from jax.experimental import pallas as pl
from jax.experimental.pallas import tpu as pltpu


_VMEM_LIMIT = 48 * 1024 * 1024  # fits v5e/v6e (128 MiB) and v7x (64 MiB) VMEM


def _cparams(*semantics):
    return pltpu.CompilerParams(dimension_semantics=semantics,
                                vmem_limit_bytes=_VMEM_LIMIT)


def _pick_token_tile(n, target=256):
    """Largest token tile <= target that divides n (multiple of 8), else n."""
    if n <= target:
        return n
    t = target
    while t >= 8:
        if n % t == 0:
            return t
        t -= 8
    return n


# ----------------------------------------------------------------------------
# 1) QKV projection (token tiled)
# ----------------------------------------------------------------------------
def _qkv_kernel(x_ref, w_ref, b_ref, o_ref):
    x = x_ref[...].astype(w_ref.dtype)
    o_ref[...] = (jnp.dot(x, w_ref[...], preferred_element_type=jnp.float32)
                  + b_ref[...]).astype(o_ref.dtype)


def qkv_proj(x, w_t, b, tile_n):
    n, d = x.shape
    dout = w_t.shape[1]
    return pl.pallas_call(
        _qkv_kernel,
        out_shape=jax.ShapeDtypeStruct((n, dout), jnp.float32),
        grid=(n // tile_n,),
        in_specs=[
            pl.BlockSpec((tile_n, d), lambda t: (t, 0)),
            pl.BlockSpec((d, dout), lambda t: (0, 0)),
            pl.BlockSpec((1, dout), lambda t: (0, 0)),
        ],
        out_specs=pl.BlockSpec((tile_n, dout), lambda t: (t, 0)),
        compiler_params=_cparams("parallel"),
    )(x, w_t, b.reshape(1, dout))


# ----------------------------------------------------------------------------
# 2) Self attention: one grid step per batch, all heads loaded in one block.
#    Inputs come straight from the (S, B, 3, H, hd) view of the QKV output
#    via BlockSpec (no JAX-level split/transpose of q/k/v).
# ----------------------------------------------------------------------------
def _attn_kernel(q_ref, k_ref, v_ref, o_ref, *, scale):
    # refs: (S, H, hd);  output ref: (H, S, hd)
    num_heads = q_ref.shape[1]
    for h in range(num_heads):  # static unroll; all heads' data already in VMEM
        q = q_ref[:, h, :].astype(jnp.float32) * scale          # (S, hd)
        k = k_ref[:, h, :].astype(jnp.float32)                   # (S, hd)
        v = v_ref[:, h, :].astype(jnp.float32)                   # (S, hd)
        s = lax.dot_general(q, k, (((1,), (1,)), ((), ())),
                            preferred_element_type=jnp.float32)  # (S, S)
        m = jnp.max(s, axis=-1, keepdims=True)
        p = jnp.exp(s - m)
        p = p * pl.reciprocal(jnp.sum(p, axis=-1, keepdims=True), approx=True)
        o_ref[h] = jnp.dot(p, v,
                           preferred_element_type=jnp.float32).astype(o_ref.dtype)
    # TODO(synk): for long sequences this should become a flash-style kernel
    #             with a KV grid axis; fine for moderate S.


def attention(qkv_r, scale):
    S, B, _, H, hd = qkv_r.shape
    q_spec = pl.BlockSpec((S, None, None, H, hd), lambda b: (0, b, 0, 0, 0))
    k_spec = pl.BlockSpec((S, None, None, H, hd), lambda b: (0, b, 1, 0, 0))
    v_spec = pl.BlockSpec((S, None, None, H, hd), lambda b: (0, b, 2, 0, 0))
    return pl.pallas_call(
        functools.partial(_attn_kernel, scale=scale),
        out_shape=jax.ShapeDtypeStruct((B, H, S, hd), jnp.float32),
        grid=(B,),
        in_specs=[q_spec, k_spec, v_spec],
        out_specs=pl.BlockSpec((None, H, S, hd), lambda b: (b, 0, 0, 0)),
        compiler_params=_cparams("parallel"),
    )(qkv_r, qkv_r, qkv_r)


# ----------------------------------------------------------------------------
# 3) Fused: out_proj matmul + residual add + LayerNorm1 + MoE gating probs
# ----------------------------------------------------------------------------
def _proj_ln1_gate_kernel(attn_ref, x_ref, wo_ref, bo_ref, g1_ref, be1_ref,
                          gw_ref, gb_ref, x1_ref, probs_ref,
                          *, eps, threshold, num_experts, apply_threshold):
    a = jnp.dot(attn_ref[...].astype(wo_ref.dtype), wo_ref[...],
                preferred_element_type=jnp.float32) + bo_ref[...]
    z = x_ref[...] + a
    mean = jnp.mean(z, axis=-1, keepdims=True)
    zc = z - mean
    var = jnp.mean(zc * zc, axis=-1, keepdims=True)
    x1 = zc * lax.rsqrt(var + eps) * g1_ref[...] + be1_ref[...]
    x1_ref[...] = x1.astype(x1_ref.dtype)

    logits = jnp.dot(x1.astype(gw_ref.dtype), gw_ref[...],
                     preferred_element_type=jnp.float32) + gb_ref[...]
    m = jnp.max(logits, axis=-1, keepdims=True)
    ex = jnp.exp(logits - m)
    probs = ex * pl.reciprocal(jnp.sum(ex, axis=-1, keepdims=True), approx=True)
    if apply_threshold:  # static: softmax gating with threshold < 1.0
        mask = (probs > threshold).astype(jnp.float32)
        sum_mask = jnp.sum(mask, axis=-1, keepdims=True)
        mask = jnp.where(sum_mask == 0.0, 1.0 / num_experts, mask)
        probs = mask * pl.reciprocal(jnp.sum(mask, axis=-1, keepdims=True),
                                     approx=True)
    probs_ref[...] = probs.astype(probs_ref.dtype)


def proj_ln1_gate(attn_flat, x_flat, wo_t, bo, g1, be1, gw_t, gb,
                  threshold, tile_n, eps=1e-5):
    n, d = x_flat.shape
    n_exp = gw_t.shape[1]
    kernel = functools.partial(
        _proj_ln1_gate_kernel, eps=eps, threshold=float(threshold),
        num_experts=n_exp, apply_threshold=bool(threshold < 1.0))
    return pl.pallas_call(
        kernel,
        out_shape=(jax.ShapeDtypeStruct((n, d), jnp.float32),
                   jax.ShapeDtypeStruct((n, n_exp), jnp.float32)),
        grid=(n // tile_n,),
        in_specs=[
            pl.BlockSpec((tile_n, d), lambda t: (t, 0)),
            pl.BlockSpec((tile_n, d), lambda t: (t, 0)),
            pl.BlockSpec((d, d), lambda t: (0, 0)),
            pl.BlockSpec((1, d), lambda t: (0, 0)),
            pl.BlockSpec((1, d), lambda t: (0, 0)),
            pl.BlockSpec((1, d), lambda t: (0, 0)),
            pl.BlockSpec((d, n_exp), lambda t: (0, 0)),
            pl.BlockSpec((1, n_exp), lambda t: (0, 0)),
        ],
        out_specs=(pl.BlockSpec((tile_n, d), lambda t: (t, 0)),
                   pl.BlockSpec((tile_n, n_exp), lambda t: (t, 0))),
        compiler_params=_cparams("parallel"),
    )(attn_flat, x_flat, wo_t, bo.reshape(1, d), g1.reshape(1, d),
      be1.reshape(1, d), gw_t, gb.reshape(1, n_exp))


# ----------------------------------------------------------------------------
# 4) Fused dense MoE + residual + LayerNorm2.
#    grid = (token_tiles [parallel], experts [arbitrary], hidden_chunks [arb]);
#    expert outputs accumulate (weighted by gating prob) into a VMEM scratch
#    that is seeded with the residual; LN2 runs in the last inner iteration.
# ----------------------------------------------------------------------------
def _moe_ln2_kernel(x1_ref, p_ref, w1_ref, b1_ref, w2_ref, b2_ref,
                    g2_ref, be2_ref, o_ref, acc_ref, *, eps):
    e_id = pl.program_id(1)
    c_id = pl.program_id(2)
    n_e = pl.num_programs(1)
    n_c = pl.num_programs(2)

    x1 = x1_ref[...]          # loaded once per step (resident across e, c)
    p_e = p_ref[...]          # (TILE_N, 1) gating prob column for expert e

    @pl.when(jnp.logical_and(e_id == 0, c_id == 0))
    def _():
        acc_ref[...] = x1     # seed accumulator with the residual

    h = jnp.maximum(
        jnp.dot(x1.astype(w1_ref.dtype), w1_ref[...],
                preferred_element_type=jnp.float32) + b1_ref[...], 0.0)
    part = jnp.dot(h.astype(w2_ref.dtype), w2_ref[...],
                   preferred_element_type=jnp.float32)

    @pl.when(c_id == 0)
    def _():
        acc_ref[...] += p_e * b2_ref[...]   # expert output bias, added once

    acc_ref[...] += p_e * part

    @pl.when(jnp.logical_and(e_id == n_e - 1, c_id == n_c - 1))
    def _():
        z = acc_ref[...]
        mean = jnp.mean(z, axis=-1, keepdims=True)
        zc = z - mean
        var = jnp.mean(zc * zc, axis=-1, keepdims=True)
        o_ref[...] = (zc * lax.rsqrt(var + eps) * g2_ref[...]
                      + be2_ref[...]).astype(o_ref.dtype)


def dense_moe_ln2(x1, probs, w1, b1, w2, b2, g2, be2, tile_n,
                  eps=1e-5, compute_dtype=jnp.float32):
    n, d = x1.shape
    n_exp, dh, _ = w1.shape            # torch layout: (E, 4D, D)
    # Split the 4D hidden dim so per-step expert weights stay small (v7x VMEM).
    dh_block = 512 if (dh > 512 and dh % 512 == 0) else dh
    n_c = dh // dh_block

    w1_t = jnp.transpose(w1, (0, 2, 1)).astype(compute_dtype)   # (E, D, 4D)
    w2_t = jnp.transpose(w2, (0, 2, 1)).astype(compute_dtype)   # (E, 4D, D)
    b1_r = b1.reshape(n_exp, 1, dh)
    b2_r = b2.reshape(n_exp, 1, d)
    # Tiny (N, E) -> (E, N, 1) so each expert's prob column arrives as (TILE_N, 1)
    probs_col = jnp.transpose(probs, (1, 0)).reshape(n_exp, n, 1)

    return pl.pallas_call(
        functools.partial(_moe_ln2_kernel, eps=eps),
        out_shape=jax.ShapeDtypeStruct((n, d), jnp.float32),
        grid=(n // tile_n, n_exp, n_c),
        in_specs=[
            pl.BlockSpec((tile_n, d), lambda t, e, c: (t, 0)),
            pl.BlockSpec((None, tile_n, 1), lambda t, e, c: (e, t, 0)),
            pl.BlockSpec((None, d, dh_block), lambda t, e, c: (e, 0, c)),
            pl.BlockSpec((None, 1, dh_block), lambda t, e, c: (e, 0, c)),
            pl.BlockSpec((None, dh_block, d), lambda t, e, c: (e, c, 0)),
            pl.BlockSpec((None, 1, d), lambda t, e, c: (e, 0, 0)),
            pl.BlockSpec((1, d), lambda t, e, c: (0, 0)),
            pl.BlockSpec((1, d), lambda t, e, c: (0, 0)),
        ],
        out_specs=pl.BlockSpec((tile_n, d), lambda t, e, c: (t, 0)),
        scratch_shapes=[pltpu.VMEM((tile_n, d), jnp.float32)],
        compiler_params=_cparams("parallel", "arbitrary", "arbitrary"),
    )(x1, probs_col, w1_t, b1_r, w2_t, b2_r,
      g2.reshape(1, d), be2.reshape(1, d))


# ----------------------------------------------------------------------------
# Full block forward
# ----------------------------------------------------------------------------
def moe_transformer_block(x, p, gating_type="softmax", top_k=1, threshold=0.5,
                          compute_dtype=jnp.float32):
    # TODO(synk): only the dense-MoE + softmax-gating (threshold-masked) path is
    #             implemented; other gating types and SparseMoE are not.
    S, B, D = x.shape
    H = p["num_heads"]
    hd = D // H
    N = S * B
    tile_n = _pick_token_tile(N)

    x_flat = x.reshape(N, D)

    # --- QKV projection (token-tiled) ---
    wqkv_t = p["in_proj_w"].T.astype(compute_dtype)
    qkv = qkv_proj(x_flat, wqkv_t, p["in_proj_b"], tile_n)     # (N, 3D)
    qkv_r = qkv.reshape(S, B, 3, H, hd)                         # free reshape

    # --- attention: per-batch kernel, all heads per step ---
    attn_bh = attention(qkv_r, 1.0 / float(np.sqrt(hd)))        # (B, H, S, hd)
    attn_flat = jnp.transpose(attn_bh, (2, 0, 1, 3)).reshape(N, D)

    # --- out_proj + residual + LN1 + gating probs (fused) ---
    wo_t = p["out_proj_w"].T.astype(compute_dtype)
    gw_t = p["gate_w"].T.astype(compute_dtype)
    x1, probs = proj_ln1_gate(attn_flat, x_flat, wo_t, p["out_proj_b"],
                              p["ln1_g"], p["ln1_b"], gw_t, p["gate_b"],
                              threshold, tile_n)

    # --- dense MoE + residual + LN2 (fused) ---
    x2 = dense_moe_ln2(x1, probs, p["w1"], p["b1"], p["w2"], p["b2"],
                       p["ln2_g"], p["ln2_b"], tile_n,
                       compute_dtype=compute_dtype)
    return x2.reshape(S, B, D)


# ----------------------------------------------------------------------------
# Pure-JAX reference (sanity check)
# ----------------------------------------------------------------------------
def reference(x, p, threshold=0.5):
    S, B, D = x.shape
    H = p["num_heads"]
    hd = D // H
    E = p["gate_w"].shape[0]
    xf = x.reshape(S * B, D)
    qkv = xf @ p["in_proj_w"].T + p["in_proj_b"]
    q, k, v = jnp.split(qkv.reshape(S, B, 3 * D), 3, axis=-1)

    def sh(t):
        return t.reshape(S, B, H, hd).transpose(1, 2, 0, 3)

    qh = sh(q) / np.sqrt(hd)
    s = jnp.einsum("bhqd,bhkd->bhqk", qh, sh(k))
    a = jax.nn.softmax(s, axis=-1)
    o = jnp.einsum("bhqk,bhkd->bhqd", a, sh(v))
    attn = o.transpose(2, 0, 1, 3).reshape(S * B, D) @ p["out_proj_w"].T + p["out_proj_b"]

    def ln(z, g, b):
        m = z.mean(-1, keepdims=True)
        var = ((z - m) ** 2).mean(-1, keepdims=True)
        return (z - m) / jnp.sqrt(var + 1e-5) * g + b

    x1 = ln(xf + attn, p["ln1_g"], p["ln1_b"])
    logits = x1 @ p["gate_w"].T + p["gate_b"]
    probs = jax.nn.softmax(logits, -1)
    mask = (probs > threshold).astype(jnp.float32)
    sm = mask.sum(-1, keepdims=True)
    mask = jnp.where(sm == 0, 1.0 / E, mask)
    probs = mask / mask.sum(-1, keepdims=True)
    outs = []
    for e in range(E):
        h = jnp.maximum(x1 @ p["w1"][e].T + p["b1"][e], 0.0)
        outs.append(h @ p["w2"][e].T + p["b2"][e])
    moe = (probs[:, :, None] * jnp.stack(outs, axis=1)).sum(axis=1)
    x2 = ln(x1 + moe, p["ln2_g"], p["ln2_b"])
    return x2.reshape(S, B, D)


# ----------------------------------------------------------------------------
if __name__ == "__main__":
    S, B, D, H, E = 8, 2, 32, 4, 4
    DH = 4 * D

    key = jax.random.PRNGKey(0)
    ks = jax.random.split(key, 20)

    def rnd(k, shape, scale=0.05):
        return (scale * jax.random.normal(k, shape)).astype(jnp.float32)

    params = {
        "num_heads": H,
        "in_proj_w": rnd(ks[0], (3 * D, D)),
        "in_proj_b": rnd(ks[1], (3 * D,)),
        "out_proj_w": rnd(ks[2], (D, D)),
        "out_proj_b": rnd(ks[3], (D,)),
        "ln1_g": (1.0 + rnd(ks[4], (D,))).astype(jnp.float32),
        "ln1_b": rnd(ks[5], (D,)),
        "ln2_g": (1.0 + rnd(ks[6], (D,))).astype(jnp.float32),
        "ln2_b": rnd(ks[7], (D,)),
        "gate_w": rnd(ks[8], (E, D)),
        "gate_b": rnd(ks[9], (E,)),
        "w1": rnd(ks[10], (E, DH, D)),
        "b1": rnd(ks[11], (E, DH)),
        "w2": rnd(ks[12], (E, D, DH)),
        "b2": rnd(ks[13], (E, D)),
    }

    x = rnd(ks[14], (S, B, D), scale=1.0)

    out = moe_transformer_block(x, params, gating_type="softmax", top_k=1,
                                threshold=0.5)
    out = jax.block_until_ready(out)

    ref = jax.block_until_ready(reference(x, params, threshold=0.5))
    np.testing.assert_allclose(np.asarray(out), np.asarray(ref),
                               rtol=1e-2, atol=1e-2)

    print("KERNEL_OK")
</pallas_src>

<mosaic_0001>
module attributes {stable_mosaic.version = 11 : i64} {
  func.func @_qkv_kernel(%arg0: i32, %arg1: memref<16x32xf32, #tpu.memory_space<vmem>>, %arg2: memref<32x96xf32, #tpu.memory_space<vmem>>, %arg3: memref<1x96xf32, #tpu.memory_space<vmem>>, %arg4: memref<16x96xf32, #tpu.memory_space<vmem>>) attributes {dimension_semantics = [#tpu.dimension_semantics<parallel>], iteration_bounds = array<i64: 1>, scalar_prefetch = 0 : i64, scratch_operands = 0 : i64, tpu.core_type = #tpu.core_type<tc>, window_params = [{transform_indices = @transform_0, window_bounds = array<i64: 16, 32>}, {pipeline_mode = #tpu.pipeline_mode<synchronous>, transform_indices = @transform_1, window_bounds = array<i64: 32, 96>}, {pipeline_mode = #tpu.pipeline_mode<synchronous>, transform_indices = @transform_2, window_bounds = array<i64: 1, 96>}, {transform_indices = @transform_3, window_bounds = array<i64: 16, 96>}]} {
    %c0 = arith.constant 0 : index
    %c0_0 = arith.constant 0 : index
    %0 = vector.load %arg1[%c0, %c0_0] : memref<16x32xf32, #tpu.memory_space<vmem>>, vector<16x32xf32>
    %c0_1 = arith.constant 0 : index
    %c0_2 = arith.constant 0 : index
    %1 = vector.load %arg2[%c0_1, %c0_2] : memref<32x96xf32, #tpu.memory_space<vmem>>, vector<32x96xf32>
    %cst = arith.constant dense<0.000000e+00> : vector<16x96xf32>
    %2 = tpu.matmul %0, %1, %cst {dimension_numbers = #tpu.dot_dimension_numbers<[1], [0], [0], [1], [0, 0, 1, 1], [], []>} : vector<16x32xf32>, vector<32x96xf32>, vector<16x96xf32> -> vector<16x96xf32>
    %c0_3 = arith.constant 0 : index
    %c0_4 = arith.constant 0 : index
    %3 = vector.load %arg3[%c0_3, %c0_4] : memref<1x96xf32, #tpu.memory_space<vmem>>, vector<1x96xf32>
    %4 = vector.broadcast %3 : vector<1x96xf32> to vector<16x96xf32>
    %5 = arith.addf %2, %4 : vector<16x96xf32>
    %c0_5 = arith.constant 0 : index
    %c0_6 = arith.constant 0 : index
    %6 = vector.load %arg4[%c0_5, %c0_6] : memref<16x96xf32, #tpu.memory_space<vmem>>, vector<16x96xf32>
    tpu.vector_store %arg4[%c0_5, %c0_6], %5 {strides = array<i32>} : memref<16x96xf32, #tpu.memory_space<vmem>>, vector<16x96xf32>,
    return
  }
  func.func @transform_0(%arg0: i32) -> (i32, i32) {
    %c0_i32 = arith.constant 0 : i32
    %c0_i32_0 = arith.constant 0 : i32
    return %arg0, %c0_i32 : i32, i32
  }
  func.func @transform_1(%arg0: i32) -> (i32, i32) {
    %c0_i32 = arith.constant 0 : i32
    %c0_i32_0 = arith.constant 0 : i32
    %c0_i32_1 = arith.constant 0 : i32
    return %c0_i32, %c0_i32_0 : i32, i32
  }
  func.func @transform_2(%arg0: i32) -> (i32, i32) {
    %c0_i32 = arith.constant 0 : i32
    %c0_i32_0 = arith.constant 0 : i32
    %c0_i32_1 = arith.constant 0 : i32
    return %c0_i32, %c0_i32_0 : i32, i32
  }
  func.func @transform_3(%arg0: i32) -> (i32, i32) {
    %c0_i32 = arith.constant 0 : i32
    %c0_i32_0 = arith.constant 0 : i32
    return %arg0, %c0_i32 : i32, i32
  }
}

</mosaic_0001>

<bundles_post_ra>
// kernel: tpu_custom_call.1
= control target key start
LH: loop header
LB: loop body
LE: loop exit
PB: predicated region body
PF: predicated region fallthrough
CT: control target
= control target key end

     0   :  { %8 = vsyncpa [#allocation3], 0  ;;  %s337_s0 = inlined_call_operand.hbm [shape: f32[16,32], index: 0, kind: input, shape index: {}]   ;;  %s338_s1 = inlined_call_operand.hbm [shape: f32[32,96], index: 1, kind: input, shape index: {}]   ;;  %s339_s2 = inlined_call_operand.vmem [shape: f32[1,96], index: 2, kind: input, shape index: {}]   ;;  %s340_s3 = inlined_call_operand.hbm [shape: f32[16,96], index: 3, kind: output, shape index: {}]  }
   0x1   :  { %9 = vsyncpa [#allocation6], 0 }
   0x2   :  { %10 = vsyncpa [#allocation4], 0  ;;  %s264_s12 = smov [#allocation2]   ;;  %s192_s16 = scalar_lea.hbm %s337_s0, 256 }
   0x3   :  { %s16_s13 = sshll.u32 %s264_s12, 4  ;;  %p193_p0 = scmp.ne.s32.totalorder %s337_s0, %s192_s16  ;;  %s17_s13 = int_to_ptr.vmem [resolvable:$true] %s16_s13 }
   0x4   :  { %p196_p1 = scmp.lt.u32.totalorder %s192_s16, %s337_s0 }
   0x6   :  { %p198_p2 = pnand %p196_p1, %p193_p0 }
   0x8   :  { %201 = shalt.err (!%p198_p2)
}
   0x9   :  { %s202_s21 = scalar_lea.vmem %s17_s13, 256  ;;  %p207_p4 = scmp.lt.s32.totalorder %s17_s13, %s17_s13 }
   0xa   :  { %p203_p3 = scmp.ne.s32.totalorder %s17_s13, %s202_s21  ;;  %p208_p5 = scmp.lt.s32.totalorder %s202_s21, %s202_s21 }
   0xc   :  { %p209_p6 = por %p208_p5, %p207_p4 }
   0xe   :  { %p210_p7 = pnand %p209_p6, %p203_p3 }
  0x10   :  { %213 = shalt.err (!%p210_p7)
}
  0x11   :  { %s265_s22 = smov 128   ;;  %s266_s23 = smov 8  }
  0x12   :  { %22 = dma.hbm_to_vmem [thread:$0]  %s337_s0, 256, %s17_s13, [#allocation3], %s265_s22, %s265_s22, %s266_s23  }
  0x13   :  { %s267_s26 = smov [#allocation5]   ;;  %s214_s30 = scalar_lea.hbm %s338_s1, 512 }
  0x14   :  { %s28_s27 = sshll.u32 %s267_s26, 4  ;;  %p215_p8 = scmp.ne.s32.totalorder %s338_s1, %s214_s30  ;;  %s29_s27 = int_to_ptr.vmem [resolvable:$true] %s28_s27 }
  0x15   :  { %p218_p9 = scmp.lt.u32.totalorder %s214_s30, %s338_s1 }
  0x17   :  { %p220_p10 = pnand %p218_p9, %p215_p8 }
  0x19   :  { %223 = shalt.err (!%p220_p10)
}
  0x1a   :  { %s224_s8 = scalar_lea.vmem %s29_s27, 512  ;;  %p229_p12 = scmp.lt.s32.totalorder %s29_s27, %s29_s27 }
  0x1b   :  { %p225_p11 = scmp.ne.s32.totalorder %s29_s27, %s224_s8  ;;  %p230_p13 = scmp.lt.s32.totalorder %s224_s8, %s224_s8 }
  0x1d   :  { %p231_p0 = por %p230_p13, %p229_p12 }
  0x1f   :  { %p232_p1 = pnand %p231_p0, %p225_p11 }
  0x21   :  { %235 = shalt.err (!%p232_p1)
}
  0x22   :  { %34 = dma.hbm_to_vmem [thread:$0]  %s338_s1, 512, %s29_s27, [#allocation6], %s265_s22, %s265_s22, %s266_s23  }
  0x23   :  { %258 = dma.done.wait [#allocation3], 256  }
  0x24   :  { %259 = vsyncadd [#allocation3], 4294967040 }
  0x25   :  { %260 = dma.done.wait [#allocation6], 512  }
  0x26   :  { %261 = vsyncadd [#allocation6], 4294966784  ;;  %vm56_vm0 = vcmask 261120   ;;  %v45_v0 = vld [vmem:[#allocation5] sm:$0xff]  ;;  %v46_v1 = vld [vmem:[#allocation5 + $0x8] sm:$0xff]  ;;  %s268_s11 = smov [#allocation7]  }
  0x27   :  { %v47_v2 = vld [vmem:[#allocation5 + $0x10] sm:$0xff]  ;;  %v179_v3 = vpack.c.bf16 %v46_v1, %v45_v0  ;;  %v48_v4 = vld [vmem:[#allocation5 + $0x18] sm:$0xff]  ;;  %s146_s12 = sshll.u32 %s268_s11, 4  ;;  %vm138_vm1 = vcmask 785408   ;;  %s147_s12 = int_to_ptr.vmem [resolvable:$true] %s146_s12 }
  0x28   :  { %v43_v5 = vld [vmem:[#allocation2] sm:$0xff]  ;;  %v183_v6 = vpack.c.bf16 %v48_v4, %v47_v2  ;;  %v44_v7 = vld [vmem:[#allocation2 + $0x8] sm:$0xff]  ;;  %s236_s13 = scalar_lea.vmem %s147_s12, 256  ;;  %p241_p3 = scmp.lt.s32.totalorder %s147_s12, %s147_s12 }
  0x29   :  { %176 = vmatprep.mubr.msk.f32.mxu0 %vm56_vm0, %v43_v5  ;;  %180 = vmatprep.subr.bf16.mxu0 %v179_v3  ;;  %v159_v8 = vld [vmem:[%s339_s2] ss:$0 sm:$0xff]  ;;  %p237_p2 = scmp.ne.s32.totalorder %s147_s12, %s236_s13  ;;  %p242_p4 = scmp.lt.s32.totalorder %s236_s13, %s236_s13 }
  0x2a   :  { %182 = vmatpush3.bf16.msra.mxu0 %v179_v3 }
  0x2b   :  { %184 = vmatprep.subr.bf16.mxu0 %v183_v6  ;;  %p243_p5 = por %p242_p4, %p241_p3 }
  0x2d   :  { %p244_p6 = pnand %p243_p5, %p237_p2 }
  0x2e   :  { %186 = vmatpush3.bf16.msra.mxu0 %v183_v6 }
  0x31   :  { %177 = vmatmul.mubr.msk.f32.vlgmr.msra.gmra.mrb[0].mxu0 %vm56_vm0, %v44_v7 }
 0x104   :  { %v178_v9 = vpop.f32.mrb[0].mxu0 }
 0x105   :  { %v135_v10 = vadd.f32 %v178_v9, %v159_v8  ;;  %v129_v11 = vpop.f32.mrb[1].mxu0 }
 0x106   :  { %v130_v12 = vadd.f32 %v159_v8, %v129_v11 }
 0x107   :  { %140 = vst.msk [vmem:[#allocation7 + $0x8] sm:$0xff] %vm138_vm1, %v135_v10 }
 0x108   :  { %139 = vst.msk [vmem:[#allocation7] sm:$0xff] %vm138_vm1, %v130_v12 }
 0x109   :  { %247 = shalt.err (!%p244_p6)
}
 0x10a   :  { %s248_s2 = scalar_lea.hbm %s340_s3, 256 }
 0x10b   :  { %p249_p7 = scmp.ne.s32.totalorder %s340_s3, %s248_s2  ;;  %p252_p8 = scmp.lt.u32.totalorder %s248_s2, %s340_s3 }
 0x10d   :  { %p254_p9 = pnand %p252_p8, %p249_p7 }
 0x10f   :  { %257 = shalt.err (!%p254_p9)
}
 0x110   :  { %152 = dma.vmem_to_hbm [thread:$0]  %s147_s12, 256, %s340_s3, [#allocation4], %s265_s22, %s265_s22, %s266_s23  }
 0x111   :  { %262 = dma.done.wait [#allocation4], 256  }
 0x112   :  { %263 = vsyncadd [#allocation4], 4294967040 }
 0x113   :  { %156 = vsyncpa [#allocation3], 1 }
 0x114   :  { %157 = vsyncpa [#allocation6], 1 }
 0x115   :  { %158 = vsyncpa [#allocation4], 1 }

</bundles_post_ra>
